<compile_context>
chip_gen: v7x
topology: tpu7x:2x2x1
jax: 0.10.0
libtpu: 0.0.40
codegen_flags: <defaults>
</compile_context>

<pallas_src>
import jax
import jax.numpy as jnp
import numpy as np
from jax import lax
from jax.experimental import pallas as pl

# ---------------- model dims (small, consistent with the module) ----------------
B = 2            # batch
T = 8            # sequence length
C = 32           # decoder_embed_dim
H = 4            # decoder_attention_heads
HEAD_DIM = C // H
FFN = 64         # decoder_ffn_embed_dim
EPS = 1e-5       # nn.LayerNorm default eps

TP1 = T + 1                  # per-(batch,head) key positions incl. bias-kv
NKEY = B * H * TP1           # 72 block-diagonal key/value rows
NEG = -1e30                  # additive mask value for cross-batch columns


def _layer_norm(x, gamma, beta):
    # PyTorch LayerNorm over last dim, biased variance, eps=1e-5
    mean = jnp.mean(x, axis=-1, keepdims=True)
    var = jnp.mean((x - mean) ** 2, axis=-1, keepdims=True)
    return (x - mean) * lax.rsqrt(var + EPS) * gamma + beta


def decoder_layer_kernel(
    x_ref,                       # (B*T, C)
    wqkv_ref, bqkv_ref,          # (C, 3C), (1, 3C)  -- Q part pre-scaled on host
    wo_ref, bo_ref,              # (C, C), (1, C)
    ln1_ref,                     # (2, C)  row0 = gamma, row1 = beta (self_attn_layer_norm)
    w1_ref, bf1_ref,             # (C, FFN), (1, FFN)
    w2_ref, bf2_ref,             # (FFN, C), (1, C)
    ln2_ref,                     # (2, C)  final_layer_norm
    r_ref,                       # (NKEY, B*T)  0/1 token-replication matrix (constant)
    mh_ref,                      # (NKEY, C)    0/1 head mask (constant)
    bkv_ref,                     # (NKEY, 2C)   [bias_k | bias_v] scattered into bias rows
    am_ref,                      # (B*T, NKEY)  additive batch-validity mask (0 / -1e30)
    o_ref,                       # (B*T, C)
):
    f32 = jnp.float32
    x = x_ref[...]                                           # (B*T, C)

    # --- fused QKV in-projection (softmax scaling already folded into Q cols) ---
    qkv = jnp.dot(x, wqkv_ref[...], preferred_element_type=f32) + bqkv_ref[...]
    q = qkv[:, :C]                                           # (B*T, C)
    kv = qkv[:, C:]                                          # (B*T, 2C) = [K | V]

    # --- block-diagonal K^T / V operands from ONE replication matmul ---
    # row (b, h, t<T) of rkv = [k_{b,t} | v_{b,t}]; row (b, h, T) = [bias_k | bias_v];
    # the head mask zeroes every channel outside head h.
    rkv = jnp.dot(r_ref[...], kv, preferred_element_type=f32) + bkv_ref[...]    # (NKEY, 2C)
    mh = mh_ref[...]                                         # (NKEY, C)
    k_blk_t = rkv[:, :C] * mh                                # (NKEY, C)  == K_block^T
    v_blk = rkv[:, C:] * mh                                  # (NKEY, C)  == V_block

    # --- all B*H per-head score matrices from ONE NT matmul ---
    s = lax.dot_general(q, k_blk_t, (((1,), (1,)), ((), ())),
                        preferred_element_type=f32) + am_ref[...]               # (B*T, NKEY)

    # one softmax for every (batch, head): the per-query-row max is a single shift
    # constant applied uniformly inside every head group of that row (exact + stable).
    m = jnp.max(s, axis=-1, keepdims=True)                   # (B*T, 1)
    p = jnp.exp(s - m)                                       # masked cols -> exp(-1e30) == 0

    num = jnp.dot(p, v_blk, preferred_element_type=f32)      # (B*T, C) head-concat numerators
    den = jnp.dot(p, mh, preferred_element_type=f32)         # (B*T, C) per-head denominators

    # EUP reciprocal + one Newton step -> ~f32 accuracy, divide off the VALU, fused once
    inv = pl.reciprocal(den, approx=True)
    inv = inv * (2.0 - den * inv)

    attn = jnp.dot(num * inv, wo_ref[...], preferred_element_type=f32) + bo_ref[...]

    # residual + post-LayerNorm (normalize_before=False)
    x1 = _layer_norm(x + attn, ln1_ref[0:1, :], ln1_ref[1:2, :])

    # --- FFN ---
    h1 = jnp.dot(x1, w1_ref[...], preferred_element_type=f32) + bf1_ref[...]
    h1 = jnp.maximum(h1, 0.0)                                # relu
    y = jnp.dot(h1, w2_ref[...], preferred_element_type=f32) + bf2_ref[...]

    o_ref[...] = _layer_norm(x1 + y, ln2_ref[0:1, :], ln2_ref[1:2, :])


def _structural_constants():
    """Constant 0/1 matrices encoding the block-diagonal attention layout."""
    R = np.zeros((NKEY, B * T), np.float32)        # replicates tokens per (batch, head)
    Mh = np.zeros((NKEY, C), np.float32)           # head(key row) == head(channel col)
    bias_row = np.zeros((NKEY, 1), np.float32)     # marks the bias-kv row of each block
    AM = np.zeros((B * T, NKEY), np.float32)       # 0 for own batch block, -1e30 otherwise
    for b in range(B):
        for h in range(H):
            base = (b * H + h) * TP1
            for t in range(T):
                R[base + t, b * T + t] = 1.0
            bias_row[base + T, 0] = 1.0
            Mh[base:base + TP1, h * HEAD_DIM:(h + 1) * HEAD_DIM] = 1.0
        AM[b * T:(b + 1) * T, :] = NEG
        AM[b * T:(b + 1) * T, b * H * TP1:(b + 1) * H * TP1] = 0.0
    return R, Mh, bias_row, AM


def transformer_decoder_layer(x, params):
    """x: (B, T, C) float32. Returns (x_out, None) matching the module's (x, attn).

    Eval mode only (dropout = identity); no attn_mask / key_padding_mask support.
    """
    (wqkv, bqkv, bias_kv, wo, bo, ln1, w1, bf1, w2, bf2, ln2) = params

    # --- host-side prep (constants / weight folding; zero kernel-time cost) ---
    scaling = HEAD_DIM ** -0.5
    scale = jnp.concatenate([jnp.full((C,), scaling, jnp.float32),
                             jnp.ones((2 * C,), jnp.float32)])
    wqkv_s = wqkv * scale[None, :]                 # fold softmax scaling into Q columns
    bqkv_s = bqkv * scale[None, :]

    R, Mh, bias_row, AM = _structural_constants()
    bkv = jnp.asarray(bias_row) * bias_kv.reshape(1, 2 * C)   # (NKEY, 2C)

    x2d = x.reshape(B * T, C)
    operands = (x2d, wqkv_s, bqkv_s, wo, bo, ln1, w1, bf1, w2, bf2, ln2,
                jnp.asarray(R), jnp.asarray(Mh), bkv, jnp.asarray(AM))

    # advisory cost estimate so XLA can overlap neighboring ops
    flops = 2 * (B * T) * C * (3 * C)            # fused QKV
    flops += 2 * NKEY * (B * T) * (2 * C)        # replication matmul
    flops += 2 * (B * T) * C * NKEY              # scores
    flops += 2 * (B * T) * NKEY * C * 2          # P @ V_block and P @ head-mask
    flops += 2 * (B * T) * C * C                 # out projection
    flops += 2 * (B * T) * C * FFN * 2           # FFN
    transcendentals = (B * T) * NKEY + (B * T) * C + 2 * (B * T)
    bytes_accessed = 4 * (sum(int(np.prod(a.shape)) for a in operands) + B * T * C)

    out2d = pl.pallas_call(
        decoder_layer_kernel,
        out_shape=jax.ShapeDtypeStruct((B * T, C), jnp.float32),
        cost_estimate=pl.CostEstimate(flops=flops,
                                      transcendentals=transcendentals,
                                      bytes_accessed=bytes_accessed),
    )(*operands)
    return out2d.reshape(B, T, C), None   # attn is None (need_weights=False)


# ----------------------------- pure-JAX reference -----------------------------
def reference(x, params):
    (wqkv, bqkv, bias_kv, wo, bo, ln1, w1, bf1, w2, bf2, ln2) = params
    wq, wk, wv = wqkv[:, :C], wqkv[:, C:2 * C], wqkv[:, 2 * C:]
    bq, bk, bv = bqkv[:, :C], bqkv[:, C:2 * C], bqkv[:, 2 * C:]
    bias_k, bias_v = bias_kv[0:1], bias_kv[1:2]
    g1, be1 = ln1[0:1], ln1[1:2]
    g2, be2 = ln2[0:1], ln2[1:2]
    scaling = HEAD_DIM ** -0.5
    outs = []
    for b in range(B):
        xb = x[b]
        q = (xb @ wq + bq) * scaling
        k = jnp.concatenate([xb @ wk + bk, bias_k], axis=0)
        v = jnp.concatenate([xb @ wv + bv, bias_v], axis=0)
        heads = []
        for h in range(H):
            sl = slice(h * HEAD_DIM, (h + 1) * HEAD_DIM)
            s = q[:, sl] @ k[:, sl].T
            p = jax.nn.softmax(s, axis=-1)
            heads.append(p @ v[:, sl])
        a = jnp.concatenate(heads, axis=1) @ wo + bo
        x1 = _layer_norm(xb + a, g1, be1)
        y = jnp.maximum(x1 @ w1 + bf1, 0.0) @ w2 + bf2
        outs.append(_layer_norm(x1 + y, g2, be2))
    return jnp.stack(outs, axis=0)


# ----------------------------- parameter init -----------------------------
def make_params(key):
    ks = jax.random.split(key, 14)
    s = 0.05
    # PyTorch in_proj_weight is (3C, C); x @ in_proj_weight.T == x @ [wq | wk | wv]
    in_proj_w = jax.random.normal(ks[0], (3 * C, C), jnp.float32) * s
    in_proj_b = jax.random.normal(ks[1], (3 * C,), jnp.float32) * s
    wqkv = in_proj_w.T                                   # (C, 3C)
    bqkv = in_proj_b.reshape(1, 3 * C)

    bias_k = jax.random.normal(ks[2], (1, C), jnp.float32) * s
    bias_v = jax.random.normal(ks[3], (1, C), jnp.float32) * s
    bias_kv = jnp.concatenate([bias_k, bias_v], axis=0)  # (2, C)

    wo = (jax.random.normal(ks[4], (C, C), jnp.float32) * s).T
    bo = jax.random.normal(ks[5], (1, C), jnp.float32) * s

    g1 = 1.0 + jax.random.normal(ks[6], (1, C), jnp.float32) * 0.01
    be1 = jax.random.normal(ks[7], (1, C), jnp.float32) * 0.01
    ln1 = jnp.concatenate([g1, be1], axis=0)             # (2, C)

    w1 = (jax.random.normal(ks[8], (FFN, C), jnp.float32) * s).T     # (C, FFN)
    bf1 = jax.random.normal(ks[9], (1, FFN), jnp.float32) * s
    w2 = (jax.random.normal(ks[10], (C, FFN), jnp.float32) * s).T    # (FFN, C)
    bf2 = jax.random.normal(ks[11], (1, C), jnp.float32) * s

    g2 = 1.0 + jax.random.normal(ks[12], (1, C), jnp.float32) * 0.01
    be2 = jax.random.normal(ks[13], (1, C), jnp.float32) * 0.01
    ln2 = jnp.concatenate([g2, be2], axis=0)             # (2, C)

    return (wqkv, bqkv, bias_kv, wo, bo, ln1, w1, bf1, w2, bf2, ln2)


if __name__ == "__main__":
    key = jax.random.PRNGKey(0)
    kx, kp = jax.random.split(key)
    x = jax.random.normal(kx, (B, T, C), jnp.float32)    # layout: (B, T, C)
    params = make_params(kp)

    out, attn = transformer_decoder_layer(x, params)
    out = jax.block_until_ready(out)

    ref = reference(x, params)
    # 1e-4 tolerance: EUP approx reciprocal + 1 Newton step is ~f32 accurate but not
    # bit-identical to an exact divide.
    np.testing.assert_allclose(np.asarray(out), np.asarray(ref), rtol=1e-4, atol=1e-4)
    print("KERNEL_OK")
</pallas_src>

<mosaic_0001>
module attributes {stable_mosaic.version = 11 : i64} {
  func.func @decoder_layer_kernel(%arg0: memref<16x32xf32, #tpu.memory_space<vmem>>, %arg1: memref<32x96xf32, #tpu.memory_space<vmem>>, %arg2: memref<1x96xf32, #tpu.memory_space<vmem>>, %arg3: memref<32x32xf32, #tpu.memory_space<vmem>>, %arg4: memref<1x32xf32, #tpu.memory_space<vmem>>, %arg5: memref<2x32xf32, #tpu.memory_space<vmem>>, %arg6: memref<32x64xf32, #tpu.memory_space<vmem>>, %arg7: memref<1x64xf32, #tpu.memory_space<vmem>>, %arg8: memref<64x32xf32, #tpu.memory_space<vmem>>, %arg9: memref<1x32xf32, #tpu.memory_space<vmem>>, %arg10: memref<2x32xf32, #tpu.memory_space<vmem>>, %arg11: memref<72x16xf32, #tpu.memory_space<vmem>>, %arg12: memref<72x32xf32, #tpu.memory_space<vmem>>, %arg13: memref<72x64xf32, #tpu.memory_space<vmem>>, %arg14: memref<16x72xf32, #tpu.memory_space<vmem>>, %arg15: memref<16x32xf32, #tpu.memory_space<vmem>>) attributes {dimension_semantics = [], scalar_prefetch = 0 : i64, scratch_operands = 0 : i64, tpu.core_type = #tpu.core_type<tc>} {
    %c0 = arith.constant 0 : index
    %c0_0 = arith.constant 0 : index
    %0 = vector.load %arg0[%c0, %c0_0] : memref<16x32xf32, #tpu.memory_space<vmem>>, vector<16x32xf32>
    %c0_1 = arith.constant 0 : index
    %c0_2 = arith.constant 0 : index
    %1 = vector.load %arg1[%c0_1, %c0_2] : memref<32x96xf32, #tpu.memory_space<vmem>>, vector<32x96xf32>
    %cst = arith.constant dense<0.000000e+00> : vector<16x96xf32>
    %2 = tpu.matmul %0, %1, %cst {dimension_numbers = #tpu.dot_dimension_numbers<[1], [0], [0], [1], [0, 0, 1, 1], [], []>} : vector<16x32xf32>, vector<32x96xf32>, vector<16x96xf32> -> vector<16x96xf32>
    %c0_3 = arith.constant 0 : index
    %c0_4 = arith.constant 0 : index
    %3 = vector.load %arg2[%c0_3, %c0_4] : memref<1x96xf32, #tpu.memory_space<vmem>>, vector<1x96xf32>
    %4 = vector.broadcast %3 : vector<1x96xf32> to vector<16x96xf32>
    %5 = arith.addf %2, %4 : vector<16x96xf32>
    %6 = vector.extract_strided_slice %5 {offsets = [0, 0], sizes = [16, 32], strides = [1, 1]} : vector<16x96xf32> to vector<16x32xf32>
    %7 = vector.extract_strided_slice %5 {offsets = [0, 32], sizes = [16, 64], strides = [1, 1]} : vector<16x96xf32> to vector<16x64xf32>
    %c0_5 = arith.constant 0 : index
    %c0_6 = arith.constant 0 : index
    %8 = vector.load %arg11[%c0_5, %c0_6] : memref<72x16xf32, #tpu.memory_space<vmem>>, vector<72x16xf32>
    %cst_7 = arith.constant dense<0.000000e+00> : vector<72x64xf32>
    %9 = tpu.matmul %8, %7, %cst_7 {dimension_numbers = #tpu.dot_dimension_numbers<[1], [0], [0], [1], [0, 0, 1, 1], [], []>} : vector<72x16xf32>, vector<16x64xf32>, vector<72x64xf32> -> vector<72x64xf32>
    %c0_8 = arith.constant 0 : index
    %c0_9 = arith.constant 0 : index
    %10 = vector.load %arg13[%c0_8, %c0_9] : memref<72x64xf32, #tpu.memory_space<vmem>>, vector<72x64xf32>
    %11 = arith.addf %9, %10 : vector<72x64xf32>
    %c0_10 = arith.constant 0 : index
    %c0_11 = arith.constant 0 : index
    %12 = vector.load %arg12[%c0_10, %c0_11] : memref<72x32xf32, #tpu.memory_space<vmem>>, vector<72x32xf32>
    %13 = vector.extract_strided_slice %11 {offsets = [0, 0], sizes = [72, 32], strides = [1, 1]} : vector<72x64xf32> to vector<72x32xf32>
    %14 = arith.mulf %13, %12 : vector<72x32xf32>
    %15 = vector.extract_strided_slice %11 {offsets = [0, 32], sizes = [72, 32], strides = [1, 1]} : vector<72x64xf32> to vector<72x32xf32>
    %16 = arith.mulf %15, %12 : vector<72x32xf32>
    %cst_12 = arith.constant dense<0.000000e+00> : vector<16x72xf32>
    %17 = tpu.matmul %6, %14, %cst_12 {dimension_numbers = #tpu.dot_dimension_numbers<[1], [1], [0], [0], [0, 0, 1, 0], [], []>} : vector<16x32xf32>, vector<72x32xf32>, vector<16x72xf32> -> vector<16x72xf32>
    %c0_13 = arith.constant 0 : index
    %c0_14 = arith.constant 0 : index
    %18 = vector.load %arg14[%c0_13, %c0_14] : memref<16x72xf32, #tpu.memory_space<vmem>>, vector<16x72xf32>
    %19 = arith.addf %17, %18 : vector<16x72xf32>
    %cst_15 = arith.constant dense<0xFF800000> : vector<16xf32>
    %20 = vector.multi_reduction <maximumf>, %19, %cst_15 [1] : vector<16x72xf32> to vector<16xf32>
    %21 = vector.shape_cast %20 : vector<16xf32> to vector<16x1xf32>
    %22 = vector.broadcast %21 : vector<16x1xf32> to vector<16x72xf32>
    %23 = arith.subf %19, %22 : vector<16x72xf32>
    %24 = math.exp %23 : vector<16x72xf32>
    %cst_16 = arith.constant dense<0.000000e+00> : vector<16x32xf32>
    %25 = tpu.matmul %24, %16, %cst_16 {dimension_numbers = #tpu.dot_dimension_numbers<[1], [0], [0], [1], [0, 0, 1, 1], [], []>} : vector<16x72xf32>, vector<72x32xf32>, vector<16x32xf32> -> vector<16x32xf32>
    %cst_17 = arith.constant dense<0.000000e+00> : vector<16x32xf32>
    %26 = tpu.matmul %24, %12, %cst_17 {dimension_numbers = #tpu.dot_dimension_numbers<[1], [0], [0], [1], [0, 0, 1, 1], [], []>} : vector<16x72xf32>, vector<72x32xf32>, vector<16x32xf32> -> vector<16x32xf32>
    %27 = tpu.reciprocal %26 {approx = true} : vector<16x32xf32> -> vector<16x32xf32>
    %28 = arith.mulf %26, %27 : vector<16x32xf32>
    %cst_18 = arith.constant 2.000000e+00 : f32
    %29 = vector.broadcast %cst_18 : f32 to vector<16x32xf32>
    %30 = arith.subf %29, %28 : vector<16x32xf32>
    %31 = arith.mulf %27, %30 : vector<16x32xf32>
    %32 = arith.mulf %25, %31 : vector<16x32xf32>
    %c0_19 = arith.constant 0 : index
    %c0_20 = arith.constant 0 : index
    %33 = vector.load %arg3[%c0_19, %c0_20] : memref<32x32xf32, #tpu.memory_space<vmem>>, vector<32x32xf32>
    %cst_21 = arith.constant dense<0.000000e+00> : vector<16x32xf32>
    %34 = tpu.matmul %32, %33, %cst_21 {dimension_numbers = #tpu.dot_dimension_numbers<[1], [0], [0], [1], [0, 0, 1, 1], [], []>} : vector<16x32xf32>, vector<32x32xf32>, vector<16x32xf32> -> vector<16x32xf32>
    %c0_22 = arith.constant 0 : index
    %c0_23 = arith.constant 0 : index
    %35 = vector.load %arg4[%c0_22, %c0_23] : memref<1x32xf32, #tpu.memory_space<vmem>>, vector<1x32xf32>
    %36 = vector.broadcast %35 : vector<1x32xf32> to vector<16x32xf32>
    %37 = arith.addf %34, %36 : vector<16x32xf32>
    %38 = arith.addf %0, %37 : vector<16x32xf32>
    %c0_24 = arith.constant 0 : index
    %c0_25 = arith.constant 0 : index
    %39 = vector.load %arg5[%c0_24, %c0_25] : memref<2x32xf32, #tpu.memory_space<vmem>>, vector<1x32xf32>
    %c1 = arith.constant 1 : index
    %c0_26 = arith.constant 0 : index
    %40 = vector.load %arg5[%c1, %c0_26] : memref<2x32xf32, #tpu.memory_space<vmem>>, vector<1x32xf32>
    %cst_27 = arith.constant dense<0.000000e+00> : vector<16xf32>
    %41 = vector.multi_reduction <add>, %38, %cst_27 [1] : vector<16x32xf32> to vector<16xf32>
    %42 = vector.shape_cast %41 : vector<16xf32> to vector<16x1xf32>
    %cst_28 = arith.constant 3.200000e+01 : f32
    %43 = vector.broadcast %cst_28 : f32 to vector<16x1xf32>
    %44 = arith.divf %42, %43 : vector<16x1xf32>
    %45 = vector.broadcast %44 : vector<16x1xf32> to vector<16x32xf32>
    %46 = arith.subf %38, %45 : vector<16x32xf32>
    %47 = arith.mulf %46, %46 : vector<16x32xf32>
    %cst_29 = arith.constant dense<0.000000e+00> : vector<16xf32>
    %48 = vector.multi_reduction <add>, %47, %cst_29 [1] : vector<16x32xf32> to vector<16xf32>
    %49 = vector.shape_cast %48 : vector<16xf32> to vector<16x1xf32>
    %cst_30 = arith.constant 3.200000e+01 : f32
    %50 = vector.broadcast %cst_30 : f32 to vector<16x1xf32>
    %51 = arith.divf %49, %50 : vector<16x1xf32>
    %52 = vector.broadcast %44 : vector<16x1xf32> to vector<16x32xf32>
    %53 = arith.subf %38, %52 : vector<16x32xf32>
    %cst_31 = arith.constant 9.99999974E-6 : f32
    %54 = vector.broadcast %cst_31 : f32 to vector<16x1xf32>
    %55 = arith.addf %51, %54 : vector<16x1xf32>
    %56 = math.rsqrt %55 : vector<16x1xf32>
    %57 = vector.broadcast %56 : vector<16x1xf32> to vector<16x32xf32>
    %58 = arith.mulf %53, %57 : vector<16x32xf32>
    %59 = vector.broadcast %39 : vector<1x32xf32> to vector<16x32xf32>
    %60 = arith.mulf %58, %59 : vector<16x32xf32>
    %61 = vector.broadcast %40 : vector<1x32xf32> to vector<16x32xf32>
    %62 = arith.addf %60, %61 : vector<16x32xf32>
    %c0_32 = arith.constant 0 : index
    %c0_33 = arith.constant 0 : index
    %63 = vector.load %arg6[%c0_32, %c0_33] : memref<32x64xf32, #tpu.memory_space<vmem>>, vector<32x64xf32>
    %cst_34 = arith.constant dense<0.000000e+00> : vector<16x64xf32>
    %64 = tpu.matmul %62, %63, %cst_34 {dimension_numbers = #tpu.dot_dimension_numbers<[1], [0], [0], [1], [0, 0, 1, 1], [], []>} : vector<16x32xf32>, vector<32x64xf32>, vector<16x64xf32> -> vector<16x64xf32>
    %c0_35 = arith.constant 0 : index
    %c0_36 = arith.constant 0 : index
    %65 = vector.load %arg7[%c0_35, %c0_36] : memref<1x64xf32, #tpu.memory_space<vmem>>, vector<1x64xf32>
    %66 = vector.broadcast %65 : vector<1x64xf32> to vector<16x64xf32>
    %67 = arith.addf %64, %66 : vector<16x64xf32>
    %cst_37 = arith.constant 0.000000e+00 : f32
    %68 = vector.broadcast %cst_37 : f32 to vector<16x64xf32>
    %69 = arith.maximumf %67, %68 : vector<16x64xf32>
    %c0_38 = arith.constant 0 : index
    %c0_39 = arith.constant 0 : index
    %70 = vector.load %arg8[%c0_38, %c0_39] : memref<64x32xf32, #tpu.memory_space<vmem>>, vector<64x32xf32>
    %cst_40 = arith.constant dense<0.000000e+00> : vector<16x32xf32>
    %71 = tpu.matmul %69, %70, %cst_40 {dimension_numbers = #tpu.dot_dimension_numbers<[1], [0], [0], [1], [0, 0, 1, 1], [], []>} : vector<16x64xf32>, vector<64x32xf32>, vector<16x32xf32> -> vector<16x32xf32>
    %c0_41 = arith.constant 0 : index
    %c0_42 = arith.constant 0 : index
    %72 = vector.load %arg9[%c0_41, %c0_42] : memref<1x32xf32, #tpu.memory_space<vmem>>, vector<1x32xf32>
    %73 = vector.broadcast %72 : vector<1x32xf32> to vector<16x32xf32>
    %74 = arith.addf %71, %73 : vector<16x32xf32>
    %75 = arith.addf %62, %74 : vector<16x32xf32>
    %c0_43 = arith.constant 0 : index
    %c0_44 = arith.constant 0 : index
    %76 = vector.load %arg10[%c0_43, %c0_44] : memref<2x32xf32, #tpu.memory_space<vmem>>, vector<1x32xf32>
    %c1_45 = arith.constant 1 : index
    %c0_46 = arith.constant 0 : index
    %77 = vector.load %arg10[%c1_45, %c0_46] : memref<2x32xf32, #tpu.memory_space<vmem>>, vector<1x32xf32>
    %cst_47 = arith.constant dense<0.000000e+00> : vector<16xf32>
    %78 = vector.multi_reduction <add>, %75, %cst_47 [1] : vector<16x32xf32> to vector<16xf32>
    %79 = vector.shape_cast %78 : vector<16xf32> to vector<16x1xf32>
    %cst_48 = arith.constant 3.200000e+01 : f32
    %80 = vector.broadcast %cst_48 : f32 to vector<16x1xf32>
    %81 = arith.divf %79, %80 : vector<16x1xf32>
    %82 = vector.broadcast %81 : vector<16x1xf32> to vector<16x32xf32>
    %83 = arith.subf %75, %82 : vector<16x32xf32>
    %84 = arith.mulf %83, %83 : vector<16x32xf32>
    %cst_49 = arith.constant dense<0.000000e+00> : vector<16xf32>
    %85 = vector.multi_reduction <add>, %84, %cst_49 [1] : vector<16x32xf32> to vector<16xf32>
    %86 = vector.shape_cast %85 : vector<16xf32> to vector<16x1xf32>
    %cst_50 = arith.constant 3.200000e+01 : f32
    %87 = vector.broadcast %cst_50 : f32 to vector<16x1xf32>
    %88 = arith.divf %86, %87 : vector<16x1xf32>
    %89 = vector.broadcast %81 : vector<16x1xf32> to vector<16x32xf32>
    %90 = arith.subf %75, %89 : vector<16x32xf32>
    %cst_51 = arith.constant 9.99999974E-6 : f32
    %91 = vector.broadcast %cst_51 : f32 to vector<16x1xf32>
    %92 = arith.addf %88, %91 : vector<16x1xf32>
    %93 = math.rsqrt %92 : vector<16x1xf32>
    %94 = vector.broadcast %93 : vector<16x1xf32> to vector<16x32xf32>
    %95 = arith.mulf %90, %94 : vector<16x32xf32>
    %96 = vector.broadcast %76 : vector<1x32xf32> to vector<16x32xf32>
    %97 = arith.mulf %95, %96 : vector<16x32xf32>
    %98 = vector.broadcast %77 : vector<1x32xf32> to vector<16x32xf32>
    %99 = arith.addf %97, %98 : vector<16x32xf32>
    %c0_52 = arith.constant 0 : index
    %c0_53 = arith.constant 0 : index
    %100 = vector.load %arg15[%c0_52, %c0_53] : memref<16x32xf32, #tpu.memory_space<vmem>>, vector<16x32xf32>
    tpu.vector_store %arg15[%c0_52, %c0_53], %99 {strides = array<i32>} : memref<16x32xf32, #tpu.memory_space<vmem>>, vector<16x32xf32>,
    return
  }
}

</mosaic_0001>

<bundles_post_ra>
// kernel: tpu_custom_call.1
= control target key start
LH: loop header
LB: loop body
LE: loop exit
PB: predicated region body
PF: predicated region fallthrough
CT: control target
= control target key end

     0   :  { %vm64_vm0 = vcmask 261120   ;;  %s1919_s0 = inlined_call_operand.vmem [shape: f32[16,32], index: 0, kind: input, shape index: {}]   ;;  %s1920_s1 = inlined_call_operand.vmem [shape: f32[32,96], index: 1, kind: input, shape index: {}]   ;;  %s1921_s2 = inlined_call_operand.vmem [shape: f32[1,96], index: 2, kind: input, shape index: {}]   ;;  %s1922_s3 = inlined_call_operand.vmem [shape: f32[32,32], index: 3, kind: input, shape index: {}]   ;;  %s1923_s4 = inlined_call_operand.vmem [shape: f32[1,32], index: 4, kind: input, shape index: {}]   ;;  %s1924_s5 = inlined_call_operand.vmem [shape: f32[2,32], index: 5, kind: input, shape index: {}]   ;;  %s1925_s6 = inlined_call_operand.vmem [shape: f32[32,64], index: 6, kind: input, shape index: {}]   ;;  %s1926_s7 = inlined_call_operand.vmem [shape: f32[1,64], index: 7, kind: input, shape index: {}]   ;;  %s1927_s8 = inlined_call_operand.vmem [shape: f32[64,32], index: 8, kind: input, shape index: {}]   ;;  %s1928_s9 = inlined_call_operand.vmem [shape: f32[1,32], index: 9, kind: input, shape index: {}]   ;;  %s1929_s10 = inlined_call_operand.vmem [shape: f32[2,32], index: 10, kind: input, shape index: {}]   ;;  %s1930_s11 = inlined_call_operand.vmem [shape: f32[72,16], index: 11, kind: input, shape index: {}]   ;;  %s1931_s12 = inlined_call_operand.vmem [shape: f32[72,32], index: 12, kind: input, shape index: {}]   ;;  %s1932_s13 = inlined_call_operand.vmem [shape: f32[72,64], index: 13, kind: input, shape index: {}]   ;;  %s1933_s14 = inlined_call_operand.vmem [shape: f32[16,72], index: 14, kind: input, shape index: {}]   ;;  %s1934_s15 = inlined_call_operand.hbm [shape: f32[16,32], index: 15, kind: output, shape index: {}]  }
   0x1   :  { %v53_v0 = vld [vmem:[%s1920_s1] sm:$0xff]  ;;  %v54_v1 = vld [vmem:[%s1920_s1 + $0x8] sm:$0xff]  ;;  %v55_v2 = vld [vmem:[%s1920_s1 + $0x10] sm:$0xff] }
   0x2   :  { %v1340_v3 = vpack.c.bf16 %v54_v1, %v53_v0  ;;  %v56_v4 = vld [vmem:[%s1920_s1 + $0x18] sm:$0xff]  ;;  %v1615_v5 = vld [vmem:[%s1919_s0] sm:$0xff] }
   0x3   :  { %v1344_v6 = vpack.c.bf16 %v56_v4, %v55_v2  ;;  %1202 = vmatprep.mubr.msk.f32.mxu0 %vm64_vm0, %v1615_v5 }
   0x4   :  { %20 = vsyncpa [#allocation3], 0  ;;  %1341 = vmatprep.subr.bf16.mxu0 %v1340_v3  ;;  %v1622_v7 = vld [vmem:[%s1919_s0 + $0x8] sm:$0xff]  ;;  %v1512_v8 = vmov 0.0|0.0   ;;  %v1082_v9 = vld [vmem:[%s1921_s2] ss:$0 sm:$0xff] }
   0x5   :  { %1343 = vmatpush3.bf16.msra.mxu0 %v1340_v3  ;;  %1348 = vmatprep.subr.bf16.mxu1 %v1512_v8  ;;  %vm1513_vm1 = vmmov 0   ;;  %v1514_v10 = vmov 0.0   ;;  %s1515_s0 = smov 96   ;;  %v1637_v16 = vld [vmem:[%s1931_s12] sm:$0xff]  ;;  %v1642_v17 = vld [vmem:[%s1931_s12 + $0x8] sm:$0xff]  ;;  %s1516_s19 = smov 32   ;;  %vm1746_vm3 = vmpackc.low %vm64_vm0, %vm64_vm0 }
   0x6   :  { %1345 = vmatprep.subr.bf16.mxu0 %v1344_v6  ;;  %1209 = vmatprep.mubr.msk.f32.mxu1 %vm1513_vm1, %v1514_v10  ;;  %v1649_v18 = vld [vmem:[%s1931_s12 + $0x10] sm:$0xff]  ;;  %v1654_v19 = vld [vmem:[%s1931_s12 + $0x18] sm:$0xff]  ;;  %v1661_v20 = vld [vmem:[%s1931_s12 + $0x20] sm:$0xff]  ;;  %vm172_vm2 = vcmask 130048   ;;  %vm481_vm4 = vcmask 588800   ;;  %vm940_vm5 = vcmask 523264  }
   0x7   :  { %339 = vrot.lane.b32.xlu1 %v1642_v17, %s1516_s19  ;;  %v1666_v21 = vld [vmem:[%s1931_s12 + $0x28] sm:$0xff]  ;;  %v1673_v22 = vld [vmem:[%s1931_s12 + $0x30] sm:$0xff]  ;;  %v1678_v23 = vld [vmem:[%s1931_s12 + $0x38] sm:$0xff]  ;;  %s1517_s1 = smov [#allocation2]  }
   0x8   :  { %v1685_v24 = vld [vmem:[%s1931_s12 + $0x40] sm:$0xff]  ;;  %v147_v30 = vld [vmem:[%s1930_s11 + $0x8] sm:$0xff]  ;;  %v148_v31 = vld [vmem:[%s1930_s11 + $0x10] sm:$0xff]  ;;  %s1071_s30 = sshll.u32 %s1517_s1, 4  ;;  %s1072_s30 = int_to_ptr.vmem [resolvable:$true] %s1071_s30 }
   0x9   :  { %1347 = vmatpush3.bf16.msra.mxu0 %v1344_v6  ;;  %v146_v29 = vld [vmem:[%s1930_s11] sm:$0xff]  ;;  %v149_v32 = vld [vmem:[%s1930_s11 + $0x18] sm:$0xff]  ;;  %v151_v34 = vld [vmem:[%s1930_s11 + $0x28] sm:$0xff]  ;;  %s1488_s16 = scalar_lea.vmem %s1072_s30, 256  ;;  %p1493_p1 = scmp.lt.s32.totalorder %s1072_s30, %s1072_s30 }
   0xa   :  { %v150_v33 = vld [vmem:[%s1930_s11 + $0x20] sm:$0xff]  ;;  %v152_v35 = vld [vmem:[%s1930_s11 + $0x30] sm:$0xff]  ;;  %v153_v36 = vld [vmem:[%s1930_s11 + $0x38] sm:$0xff]  ;;  %p1489_p0 = scmp.ne.s32.totalorder %s1072_s30, %s1488_s16  ;;  %p1494_p2 = scmp.lt.s32.totalorder %s1488_s16, %s1488_s16 }
   0xb   :  { %341 = vrot.lane.b32.xlu1 %v1649_v18, %s1516_s19  ;;  %v154_v37 = vld [vmem:[%s1930_s11 + $0x40] sm:$0xff]  ;;  %v156_v41 = vld [vmem:[%s1932_s13 + $0x8] sm:$0xff]  ;;  %v157_v52 = vld [vmem:[%s1932_s13 + $0x10] sm:$0xff] }
   0xc   :  { %1203 = vmatmul.mubr.msk.f32.vlgmr.msra.gmra.mrb[0].mxu0 %vm64_vm0, %v1622_v7  ;;  %v155_v38 = vld [vmem:[%s1932_s13] sm:$0xff]  ;;  %v158_v58 = vld [vmem:[%s1932_s13 + $0x18] sm:$0xff]  ;;  %p1495_p3 = por %p1494_p2, %p1493_p1 }
   0xd   :  { %v159_v6 = vld [vmem:[%s1932_s13 + $0x20] sm:$0xff] }
   0xe   :  { %p1496_p4 = pnand %p1495_p3, %p1489_p0 }
   0xf   :  { %345 = vrot.lane.b32.xlu1 %v1661_v20, %s1516_s19 }
  0x13   :  { %349 = vrot.lane.b32.xlu1 %v1673_v22, %s1516_s19 }
  0x17   :  { %353 = vrot.lane.b32.xlu1 %v1685_v24, %s1516_s19 }
  0x79   :  { %v340_v45 = vpop.permute.xlu1 %339 }
  0x7d   :  { %v342_v60 = vpop.permute.xlu1 %341 }
  0xdf   :  { %v1204_v11 = vpop.f32.mrb[0].mxu0 }
  0xe0   :  { %v1630_v12 = vadd.f32 %v1204_v11, %v1082_v9  ;;  %v137_v13 = vpop.f32.mrb[1].mxu0 }
  0xe1   :  { %v138_v14 = vadd.f32 %v1082_v9, %v137_v13  ;;  %v160_v13 = vld [vmem:[%s1932_s13 + $0x28] sm:$0xff] }
  0xe3   :  { %v1447_v15 = vpack.i.bf16 %v1630_v12, %v138_v14 }
  0xe5   :  { %1448 = vrot.lane.b32.xlu0 %v1447_v15, %s1515_s0  ;;  %v346_v15 = vpop.permute.xlu1 %345 }
  0xe9   :  { %337 = vrot.lane.b32.xlu0 %v1637_v16, %s1516_s19 }
  0xed   :  { %343 = vrot.lane.b32.xlu0 %v1654_v19, %s1516_s19 }
  0xf1   :  { %347 = vrot.lane.b32.xlu0 %v1666_v21, %s1516_s19 }
  0xf5   :  { %351 = vrot.lane.b32.xlu0 %v1678_v23, %s1516_s19 }
 0x157   :  { %v1449_v25 = vpop.permute.xlu0 %1448 }
 0x158   :  { %v1451_v26 = vunpack.i.h.bf16 %v1449_v25  ;;  %v1450_v27 = vunpack.i.l.bf16 %v1449_v25 }
 0x15a   :  { %v1349_v28 = vpack.c.bf16 %v1451_v26, %v1450_v27 }
 0x15b   :  { %v338_v43 = vpop.permute.xlu0 %337 }
 0x15c   :  { %1350 = vmatpush3.bf16.msra.mxu1 %v1349_v28 }
 0x15f   :  { %1210 = vmatmul.mubr.msk.f32.vlgmr.msra.gmra.mrb[0].mxu1 %vm172_vm2, %v146_v29  ;;  %v344_v62 = vpop.permute.xlu0 %343 }
 0x160   :  { %1212 = vmatprep.mubr.msk.f32.mxu1 %vm1513_vm1, %v1514_v10 }
 0x163   :  { %1213 = vmatmul.mubr.msk.f32.gmra.mrb[2].mxu1 %vm172_vm2, %v147_v30  ;;  %v348_v26 = vpop.permute.xlu0 %347 }
 0x164   :  { %1215 = vmatprep.mubr.msk.f32.mxu1 %vm1513_vm1, %v1514_v10 }
 0x167   :  { %1216 = vmatmul.mubr.msk.f32.gmra.mrb[4].mxu1 %vm172_vm2, %v148_v31 }
 0x168   :  { %1218 = vmatprep.mubr.msk.f32.mxu1 %vm1513_vm1, %v1514_v10 }
 0x16b   :  { %1219 = vmatmul.mubr.msk.f32.gmra.mrb[6].mxu1 %vm172_vm2, %v149_v32 }
 0x16c   :  { %1221 = vmatprep.mubr.msk.f32.mxu1 %vm1513_vm1, %v1514_v10 }
 0x16f   :  { %1222 = vmatmul.mubr.msk.f32.gmra.mrb[8].mxu1 %vm172_vm2, %v150_v33  ;;  %v161_v33 = vld [vmem:[%s1932_s13 + $0x30] sm:$0xff] }
 0x170   :  { %1224 = vmatprep.mubr.msk.f32.mxu1 %vm1513_vm1, %v1514_v10 }
 0x173   :  { %1225 = vmatmul.mubr.msk.f32.gmra.mrb[10].mxu1 %vm172_vm2, %v151_v34 }
 0x174   :  { %1227 = vmatprep.mubr.msk.f32.mxu1 %vm1513_vm1, %v1514_v10 }
 0x177   :  { %1228 = vmatmul.mubr.msk.f32.gmra.mrb[12].mxu1 %vm172_vm2, %v152_v35 }
 0x178   :  { %1230 = vmatprep.mubr.msk.f32.mxu1 %vm1513_vm1, %v1514_v10 }
 0x17b   :  { %1231 = vmatmul.mubr.msk.f32.gmra.mrb[14].mxu1 %vm172_vm2, %v153_v36 }
 0x17c   :  { %1233 = vmatprep.mubr.msk.f32.mxu1 %vm1513_vm1, %v1514_v10 }
 0x17f   :  { %1234 = vmatmul.mubr.msk.f32.gmra.mrb[16].mxu1 %vm172_vm2, %v154_v37 }
 0x180   :  { %1254 = vmatprep.mubr.msk.f32.mxu1 %vm64_vm0, %v138_v14 }
 0x232   :  { %v266_v39 = vpop.f32.mrb[0].mxu1 }
 0x233   :  { %v1211_v40 = vpop.f32.mrb[1].mxu1  ;;  %v267_v42 = vadd.f32 %v266_v39, %v155_v38  ;;  %v162_v38 = vld [vmem:[%s1932_s13 + $0x38] sm:$0xff] }
 0x234   :  { %v350_v40 = vpop.permute.xlu1 %349 }
 0x235   :  { %v319_v48 = vmul.f32 %v1637_v16, %v267_v42  ;;  %v364_v49 = vmul.f32 %v338_v43, %v267_v42  ;;  %v352_v42 = vpop.permute.xlu0 %351 }
 0x236   :  { %v271_v44 = vpop.f32.mrb[2].mxu1 }
 0x237   :  { %v272_v46 = vadd.f32 %v271_v44, %v156_v41  ;;  %v1214_v47 = vpop.f32.mrb[3].mxu1 }
 0x239   :  { %v320_v50 = vmul.f32 %v1642_v17, %v272_v46  ;;  %v365_v51 = vmul.f32 %v340_v45, %v272_v46  ;;  %v163_v45 = vld [vmem:[%s1932_s13 + $0x40] sm:$0xff] }
 0x23a   :  { %v276_v53 = vpop.f32.mrb[4].mxu1 }
 0x23b   :  { %v1351_v55 = vpack.c.bf16 %v320_v50, %v319_v48  ;;  %v1452_v56 = vpack.i.bf16 %v365_v51, %v364_v49  ;;  %v1217_v57 = vpop.f32.mrb[5].mxu1  ;;  %v277_v59 = vadd.f32 %v276_v53, %v157_v52 }
 0x23d   :  { %1453 = vrot.lane.b32.xlu0 %v1452_v56, %s1515_s0  ;;  %1353 = vmatprep.subr.msk.bf16.mxu1 %vm1746_vm3, %v1351_v55  ;;  %v321_v1 = vmul.f32 %v1649_v18, %v277_v59  ;;  %v366_v2 = vmul.f32 %v342_v60, %v277_v59 }
 0x23e   :  { %v281_v61 = vpop.f32.mrb[6].mxu1  ;;  %1356 = vmatpush3.bf16.xpose.msk.msra.mxu1 %vm1746_vm3, %v1351_v55 }
 0x23f   :  { %v282_v63 = vadd.f32 %v281_v61, %v158_v58  ;;  %v1220_v0 = vpop.f32.mrb[7].mxu1  ;;  %v354_v61 = vpop.permute.xlu1 %353 }
 0x241   :  { %v322_v3 = vmul.f32 %v1654_v19, %v282_v63  ;;  %v367_v4 = vmul.f32 %v344_v62, %v282_v63 }
 0x242   :  { %v286_v8 = vpop.f32.mrb[8].mxu1 }
 0x243   :  { %v1357_v9 = vpack.c.bf16 %v322_v3, %v321_v1  ;;  %v1457_v10 = vpack.i.bf16 %v367_v4, %v366_v2  ;;  %v1223_v11 = vpop.f32.mrb[9].mxu1  ;;  %v287_v14 = vadd.f32 %v286_v8, %v159_v6  ;;  %v373_v6 = vld [vmem:[%s1933_s14] sm:$0xff] }
 0x245   :  { %1458 = vrot.lane.b32.xlu1 %v1457_v10, %s1515_s0  ;;  %1359 = vmatprep.subr.msk.bf16.mxu1 %vm1746_vm3, %v1357_v9  ;;  %v323_v29 = vmul.f32 %v1661_v20, %v287_v14  ;;  %v368_v30 = vmul.f32 %v346_v15, %v287_v14 }
 0x246   :  { %v291_v25 = vpop.f32.mrb[10].mxu1  ;;  %1362 = vmatpush3.bf16.xpose.msk.msra.mxu1 %vm1746_vm3, %v1357_v9 }
 0x247   :  { %v292_v27 = vadd.f32 %v291_v25, %v160_v13  ;;  %v1226_v28 = vpop.f32.mrb[11].mxu1 }
 0x249   :  { %v324_v31 = vmul.f32 %v1666_v21, %v292_v27  ;;  %v369_v32 = vmul.f32 %v348_v26, %v292_v27 }
 0x24a   :  { %v296_v34 = vpop.f32.mrb[12].mxu1 }
 0x24b   :  { %v1363_v35 = vpack.c.bf16 %v324_v31, %v323_v29  ;;  %v1462_v36 = vpack.i.bf16 %v369_v32, %v368_v30  ;;  %v1229_v37 = vpop.f32.mrb[13].mxu1  ;;  %v297_v39 = vadd.f32 %v296_v34, %v161_v33 }
 0x24d   :  { %1463 = vrot.lane.b32.xlu0 %v1462_v36, %s1515_s0  ;;  %1365 = vmatprep.subr.msk.bf16.mxu1 %vm1746_vm3, %v1363_v35  ;;  %v325_v46 = vmul.f32 %v1673_v22, %v297_v39  ;;  %v370_v47 = vmul.f32 %v350_v40, %v297_v39  ;;  %v1391_v36 = vpack.c.bf16 %v1642_v17, %v1637_v16  ;;  %v696_v17 = vld [vmem:[%s1922_s3] sm:$0xff] }
 0x24e   :  { %v301_v41 = vpop.f32.mrb[14].mxu1  ;;  %1368 = vmatpush3.bf16.xpose.msk.msra.mxu1 %vm1746_vm3, %v1363_v35  ;;  %v1399_v40 = vpack.c.bf16 %v1666_v21, %v1661_v20  ;;  %v1403_v16 = vpack.c.bf16 %v1678_v23, %v1673_v22  ;;  %v698_v20 = vld [vmem:[%s1922_s3 + $0x10] sm:$0xff]  ;;  %v699_v21 = vld [vmem:[%s1922_s3 + $0x18] sm:$0xff] }
 0x24f   :  { %v302_v43 = vadd.f32 %v301_v41, %v162_v38  ;;  %v1232_v44 = vpop.f32.mrb[15].mxu1  ;;  %v1395_v38 = vpack.c.bf16 %v1654_v19, %v1649_v18  ;;  %v697_v18 = vld [vmem:[%s1922_s3 + $0x8] sm:$0xff]  ;;  %v1411_v22 = vpack.c.bf16 %v699_v21, %v698_v20 }
 0x250   :  { %v1407_v19 = vpack.c.bf16 %v697_v18, %v696_v17  ;;  %v1113_v18 = vld [vmem:[%s1924_s5 + $0x1] ss:$0 sm:$0xff] }
 0x251   :  { %v326_v48 = vmul.f32 %v1678_v23, %v302_v43  ;;  %v371_v49 = vmul.f32 %v352_v42, %v302_v43 }
 0x252   :  { %v306_v50 = vpop.f32.mrb[16].mxu1 }
 0x253   :  { %v1369_v51 = vpack.c.bf16 %v326_v48, %v325_v46  ;;  %v1467_v52 = vpack.i.bf16 %v371_v49, %v370_v47  ;;  %v307_v53 = vadd.f32 %v306_v50, %v163_v45  ;;  %v1235_v55 = vpop.f32.mrb[17].mxu1 }
 0x255   :  { %1371 = vmatprep.subr.msk.bf16.mxu1 %vm1746_vm3, %v1369_v51  ;;  %v327_v56 = vmul.f32 %v1685_v24, %v307_v53  ;;  %v372_v15 = vmul.f32 %v354_v61, %v307_v53  ;;  %v1109_v53 = vld [vmem:[%s1923_s4] ss:$0 sm:$0xff] }
 0x256   :  { %1374 = vmatpush3.bf16.xpose.msk.msra.mxu1 %vm1746_vm3, %v1369_v51 }
 0x257   :  { %1252 = vmatprep.subr.msk.mxu1 %vm64_vm0, %v327_v56 }
 0x25e   :  { %1253 = vmatpush3.xpose.msk.msra.mxu1 %vm64_vm0, %v327_v56 }
 0x261   :  { %1255 = vmatmul.mubr.msk.f32.vlgmr.msra.gmra.mrb[18].mxu1 %vm64_vm0, %v1630_v12  ;;  %v374_v12 = vld [vmem:[%s1933_s14 + $0x8] sm:$0xff] }
 0x2af   :  { %v1454_v57 = vpop.permute.xlu0 %1453 }
 0x2b0   :  { %v1456_v58 = vunpack.i.h.bf16 %v1454_v57  ;;  %v1455_v59 = vunpack.i.l.bf16 %v1454_v57 }
 0x2b2   :  { %v1375_v60 = vpack.c.bf16 %v1456_v58, %v1455_v59 }
 0x2b4   :  { %1376 = vmatprep.subr.bf16.mxu0 %v1375_v60 }
 0x2b5   :  { %1378 = vmatpush3.bf16.msra.mxu0 %v1375_v60 }
 0x2b7   :  { %v1459_v62 = vpop.permute.xlu1 %1458 }
 0x2b8   :  { %v1461_v63 = vunpack.i.h.bf16 %v1459_v62  ;;  %v1460_v0 = vunpack.i.l.bf16 %v1459_v62 }
 0x2ba   :  { %v1379_v1 = vpack.c.bf16 %v1461_v63, %v1460_v0 }
 0x2bc   :  { %1380 = vmatprep.subr.bf16.mxu0 %v1379_v1 }
 0x2bd   :  { %1382 = vmatpush3.bf16.msra.mxu0 %v1379_v1 }
 0x2bf   :  { %v1464_v54 = vpop.permute.xlu0 %1463 }
 0x2c0   :  { %v1466_v2 = vunpack.i.h.bf16 %v1464_v54  ;;  %v1465_v3 = vunpack.i.l.bf16 %v1464_v54 }
 0x2c2   :  { %v1383_v4 = vpack.c.bf16 %v1466_v2, %v1465_v3 }
 0x2c4   :  { %1384 = vmatprep.subr.bf16.mxu0 %v1383_v4 }
 0x2c5   :  { %1386 = vmatpush3.bf16.msra.mxu0 %v1383_v4 }
 0x334   :  { %v1256_v8 = vpop.f32.mrb[18].mxu1 }
 0x335   :  { %v478_v9 = vadd.f32 %v1256_v8, %v374_v12  ;;  %v472_v10 = vpop.f32.mrb[19].mxu1  ;;  %v832_v8 = vld [vmem:[%s1925_s6 + $0x8] sm:$0xff] }
 0x336   :  { %v473_v11 = vadd.f32 %v472_v10, %v373_v6  ;;  %v833_v10 = vld [vmem:[%s1925_s6 + $0x10] sm:$0xff] }
 0x337   :  { %v485_v13 = vsel %vm481_vm4, %v478_v9, -inf }
 0x338   :  { %486 = vmax.xlane.f32.xlu1 %v485_v13  ;;  %v482_v14 = vsel %vm481_vm4, %v473_v11, -inf }
 0x339   :  { %483 = vmax.xlane.f32.xlu0 %v482_v14  ;;  %v925_v14 = vld [vmem:[%s1927_s8] sm:$0xff] }
 0x349   :  { %1468 = vrot.lane.b32.xlu1 %v1467_v52, %s1515_s0 }
 0x34f   :  { %519 = vrot.lane.b32.xlu0 %v372_v15, %s1515_s0  ;;  %v926_v15 = vld [vmem:[%s1927_s8 + $0x8] sm:$0xff] }
 0x3c5   :  { %v487_v25 = vpop.xlane.xlu1 %486 }
 0x3c6   :  { %v489_v26 = vsub.f32 %v478_v9, %v487_v25  ;;  %v484_v27 = vpop.xlane.xlu0 %483  ;;  %v927_v25 = vld [vmem:[%s1927_s8 + $0x10] sm:$0xff] }
 0x3c7   :  { %v488_v28 = vsub.f32 %v473_v11, %v484_v27  ;;  %v834_v11 = vld [vmem:[%s1925_s6 + $0x18] sm:$0xff] }
 0x3c8   :  { %v492_v29 = vmul.f32 1.442695, %v489_v26  ;;  %v1419_v13 = vpack.c.bf16 %v834_v11, %v833_v10  ;;  %v1423_v26 = vpack.c.bf16 %v926_v15, %v925_v14  ;;  %v928_v27 = vld [vmem:[%s1927_s8 + $0x18] sm:$0xff]  ;;  %v1120_v10 = vld [vmem:[%s1929_s10] ss:$0 sm:$0xff] }
 0x3c9   :  { %v490_v30 = vmul.f32 1.442695, %v488_v28  ;;  %v1469_v31 = vpop.permute.xlu1 %1468  ;;  %v1427_v28 = vpack.c.bf16 %v928_v27, %v927_v25  ;;  %v1121_v15 = vld [vmem:[%s1929_s10 + $0x1] ss:$0 sm:$0xff] }
 0x3ca   :  { %v1471_v32 = vunpack.i.h.bf16 %v1469_v31  ;;  %v1470_v33 = vunpack.i.l.bf16 %v1469_v31  ;;  %v520_v35 = vpop.permute.xlu0 %519  ;;  %1424 = vmatprep.subr.bf16.mxu1 %v1423_v26 }
 0x3cb   :  { %1472 = vpow2.f32 %v490_v30  ;;  %v930_v30 = vld [vmem:[%s1927_s8 + $0x28] sm:$0xff]  ;;  %1426 = vmatpush3.bf16.msra.mxu1 %v1423_v26 }
 0x3cc   :  { %1474 = vpow2.f32 %v492_v29  ;;  %v1387_v34 = vpack.c.bf16 %v1471_v32, %v1470_v33  ;;  %v929_v29 = vld [vmem:[%s1927_s8 + $0x20] sm:$0xff]  ;;  %1428 = vmatprep.subr.bf16.mxu1 %v1427_v28 }
 0x3cd   :  { %v1431_v31 = vpack.c.bf16 %v930_v30, %v929_v29 }
 0x3ce   :  { %1388 = vmatprep.subr.bf16.mxu0 %v1387_v34 }
 0x3cf   :  { %1390 = vmatpush3.bf16.msra.mxu0 %v1387_v34  ;;  %1430 = vmatpush3.bf16.msra.mxu1 %v1427_v28 }
 0x3d0   :  { %1273 = vmatprep.subr.mxu0 %v520_v35  ;;  %1432 = vmatprep.subr.bf16.mxu1 %v1431_v31 }
 0x3d3   :  { %1274 = vmatpush3.msra.mxu0 %v520_v35  ;;  %1434 = vmatpush3.bf16.msra.mxu1 %v1431_v31 }
 0x3d4   :  { %1392 = vmatprep.subr.bf16.mxu0 %v1391_v36 }
 0x3d5   :  { %v1473_v37 = vpop.eup %1472 }
 0x3d6   :  { %v1475_v39 = vpop.eup %1474  ;;  %1275 = vmatprep.mubr.msk.f32.mxu0 %vm481_vm4, %v1473_v37 }
 0x3d7   :  { %1276 = vmatmul.mubr.msk.f32.vlgmr.msra.gmra.mrb[2].mxu0 %vm481_vm4, %v1475_v39 }
 0x3d8   :  { %1394 = vmatpush3.bf16.msra.mxu0 %v1391_v36  ;;  %1296 = vmatprep.mubr.msk.f32.mxu0 %vm481_vm4, %v1473_v37 }
 0x3d9   :  { %1396 = vmatprep.subr.bf16.mxu0 %v1395_v38 }
 0x3dc   :  { %1398 = vmatpush3.bf16.msra.mxu0 %v1395_v38 }
 0x3dd   :  { %1400 = vmatprep.subr.bf16.mxu0 %v1399_v40 }
 0x3e0   :  { %1402 = vmatpush3.bf16.msra.mxu0 %v1399_v40 }
 0x3e1   :  { %1404 = vmatprep.subr.bf16.mxu0 %v1403_v16 }
 0x3e4   :  { %1406 = vmatpush3.bf16.msra.mxu0 %v1403_v16 }
 0x3e5   :  { %1294 = vmatprep.subr.mxu0 %v1685_v24 }
 0x3e8   :  { %1295 = vmatpush3.msra.mxu0 %v1685_v24 }
 0x3e9   :  { %1297 = vmatmul.mubr.msk.f32.vlgmr.msra.gmra.mrb[4].mxu0 %vm481_vm4, %v1475_v39  ;;  %1408 = vmatprep.subr.bf16.mxu0 %v1407_v19  ;;  %v1112_v39 = vld [vmem:[%s1924_s5] ss:$0 sm:$0xff] }
 0x3ea   :  { %1410 = vmatpush3.bf16.msra.mxu0 %v1407_v19 }
 0x3eb   :  { %1412 = vmatprep.subr.bf16.mxu0 %v1411_v22 }
 0x3ee   :  { %1414 = vmatpush3.bf16.msra.mxu0 %v1411_v22 }
 0x4aa   :  { %v1277_v23 = vpop.f32.mrb[2].mxu0 }
 0x4ab   :  { %v602_v24 = vpop.f32.mrb[3].mxu0 }
 0x4bc   :  { %v1298_v41 = vpop.f32.mrb[4].mxu0 }
 0x4bd   :  { %1476 = vrcp.f32 %v1298_v41  ;;  %v677_v42 = vpop.f32.mrb[5].mxu0 }
 0x4be   :  { %1478 = vrcp.f32 %v677_v42 }
 0x4c7   :  { %v1477_v43 = vpop.eup %1476 }
 0x4c8   :  { %v1479_v44 = vpop.eup %1478  ;;  %v689_v45 = vmul.f32 %v1477_v43, %v1298_v41 }
 0x4c9   :  { %v688_v46 = vmul.f32 %v1479_v44, %v677_v42  ;;  %v1114_v42 = vld [vmem:[%s1926_s7] ss:$0 sm:$0xff] }
 0x4ca   :  { %v691_v47 = vsub.f32 2.0, %v689_v45 }
 0x4cb   :  { %v690_v48 = vsub.f32 2.0, %v688_v46 }
 0x4cc   :  { %v693_v49 = vmul.f32 %v1477_v43, %v691_v47 }
 0x4cd   :  { %v692_v50 = vmul.f32 %v1479_v44, %v690_v48 }
 0x4ce   :  { %v695_v51 = vmul.f32 %v1277_v23, %v693_v49  ;;  %v931_v23 = vld [vmem:[%s1927_s8 + $0x30] sm:$0xff]  ;;  %v1117_v49 = vld [vmem:[%s1928_s9] ss:$0 sm:$0xff] }
 0x4cf   :  { %v694_v52 = vmul.f32 %v692_v50, %v602_v24  ;;  %v932_v24 = vld [vmem:[%s1927_s8 + $0x38] sm:$0xff] }
 0x4d0   :  { %v1435_v41 = vpack.c.bf16 %v932_v24, %v931_v23 }
 0x4d1   :  { %1307 = vmatprep.mubr.msk.f32.mxu0 %vm64_vm0, %v694_v52 }
 0x4d2   :  { %1308 = vmatmul.mubr.msk.f32.vlgmr.msra.gmra.mrb[6].mxu0 %vm64_vm0, %v695_v51  ;;  %1436 = vmatprep.subr.bf16.mxu1 %v1435_v41 }
 0x4d3   :  { %1438 = vmatpush3.bf16.msra.mxu1 %v1435_v41 }
 0x5a5   :  { %v1309_v55 = vpop.f32.mrb[6].mxu0 }
 0x5a6   :  { %v785_v56 = vadd.f32 %v1309_v55, %v1109_v53  ;;  %v779_v57 = vpop.f32.mrb[7].mxu0 }
 0x5a7   :  { %v780_v58 = vadd.f32 %v1109_v53, %v779_v57 }
 0x5a8   :  { %v789_v59 = vadd.f32 %v785_v56, %v1622_v7 }
 0x5a9   :  { %v788_v60 = vadd.f32 %v780_v58, %v1615_v5  ;;  %v831_v5 = vld [vmem:[%s1925_s6] sm:$0xff] }
 0x5aa   :  { %v795_v61 = vsel %vm64_vm0, %v789_v59, 0.0  ;;  %v1415_v9 = vpack.c.bf16 %v832_v8, %v831_v5 }
 0x5ab   :  { %796 = vadd.xlane.f32.xlu0 %v795_v61  ;;  %v792_v62 = vsel %vm64_vm0, %v788_v60, 0.0 }
 0x5ac   :  { %793 = vadd.xlane.f32.xlu1 %v792_v62  ;;  %1416 = vmatprep.subr.bf16.mxu0 %v1415_v9 }
 0x5ad   :  { %1418 = vmatpush3.bf16.msra.mxu0 %v1415_v9 }
 0x5ae   :  { %1420 = vmatprep.subr.bf16.mxu0 %v1419_v13 }
 0x5b1   :  { %1422 = vmatpush3.bf16.msra.mxu0 %v1419_v13 }
 0x638   :  { %v797_v63 = vpop.xlane.xlu0 %796 }
 0x639   :  { %v800_v0 = vmul.f32 0.03125, %v797_v63  ;;  %v794_v1 = vpop.xlane.xlu1 %793 }
 0x63a   :  { %v799_v54 = vmul.f32 0.03125, %v794_v1 }
 0x63b   :  { %v802_v2 = vsub.f32 %v789_v59, %v800_v0 }
 0x63c   :  { %v801_v3 = vsub.f32 %v788_v60, %v799_v54 }
 0x63d   :  { %v804_v4 = vmul.f32 %v802_v2, %v802_v2 }
 0x63e   :  { %v803_v12 = vmul.f32 %v801_v3, %v801_v3 }
 0x63f   :  { %v808_v6 = vsel %vm64_vm0, %v804_v4, 0.0 }
 0x640   :  { %809 = vadd.xlane.f32.xlu1 %v808_v6  ;;  %v805_v7 = vsel %vm64_vm0, %v803_v12, 0.0 }
 0x641   :  { %806 = vadd.xlane.f32.xlu0 %v805_v7 }
 0x6cd   :  { %v810_v32 = vpop.xlane.xlu1 %809 }
 0x6ce   :  { %v812_v33 = vmul.f32 0.03125, %v810_v32  ;;  %v807_v34 = vpop.xlane.xlu0 %806 }
 0x6cf   :  { %v811_v35 = vmul.f32 0.03125, %v807_v34 }
 0x6d0   :  { %v814_v36 = vadd.f32 1e-05, %v812_v33 }
 0x6d1   :  { %v813_v37 = vadd.f32 1e-05, %v811_v35 }
 0x6d2   :  { %1480 = vrsqrt.f32 %v814_v36 }
 0x6d3   :  { %1482 = vrsqrt.f32 %v813_v37 }
 0x6dc   :  { %v1481_v38 = vpop.eup %1480 }
 0x6dd   :  { %v1483_v40 = vpop.eup %1482  ;;  %v818_v16 = vmul.f32 %v1481_v38, %v802_v2 }
 0x6de   :  { %v817_v17 = vmul.f32 %v1483_v40, %v801_v3 }
 0x6df   :  { %v824_v19 = vmul.f32 %v1112_v39, %v818_v16 }
 0x6e0   :  { %v823_v20 = vmul.f32 %v1112_v39, %v817_v17 }
 0x6e1   :  { %v830_v22 = vadd.f32 %v1113_v18, %v824_v19 }
 0x6e2   :  { %v829_v21 = vadd.f32 %v1113_v18, %v823_v20 }
 0x6e4   :  { %1318 = vmatprep.mubr.msk.f32.mxu0 %vm64_vm0, %v829_v21 }
 0x6e5   :  { %1319 = vmatmul.mubr.msk.f32.vlgmr.msra.gmra.mrb[8].mxu0 %vm64_vm0, %v830_v22 }
 0x7b8   :  { %v1320_v43 = vpop.f32.mrb[8].mxu0 }
 0x7b9   :  { %v920_v44 = vadd.f32 %v1320_v43, %v1114_v42  ;;  %v914_v45 = vpop.f32.mrb[9].mxu0 }
 0x7ba   :  { %v915_v46 = vadd.f32 %v1114_v42, %v914_v45 }
 0x7bb   :  { %v924_v48 = vmax.f32 %v920_v44, 0.0 }
 0x7bc   :  { %v923_v47 = vmax.f32 %v915_v46, 0.0 }
 0x7be   :  { %1337 = vmatprep.mubr.msk.f32.mxu1 %vm940_vm5, %v923_v47 }
 0x7bf   :  { %1338 = vmatmul.mubr.msk.f32.vlgmr.msra.gmra.mrb[20].mxu1 %vm940_vm5, %v924_v48 }
 0x892   :  { %v1339_v50 = vpop.f32.mrb[20].mxu1 }
 0x893   :  { %v1019_v51 = vadd.f32 %v1339_v50, %v1117_v49  ;;  %v1013_v52 = vpop.f32.mrb[21].mxu1 }
 0x894   :  { %v1014_v53 = vadd.f32 %v1117_v49, %v1013_v52 }
 0x895   :  { %v1023_v55 = vadd.f32 %v1019_v51, %v830_v22 }
 0x896   :  { %v1022_v56 = vadd.f32 %v1014_v53, %v829_v21 }
 0x897   :  { %v1029_v57 = vsel %vm64_vm0, %v1023_v55, 0.0 }
 0x898   :  { %1030 = vadd.xlane.f32.xlu1 %v1029_v57  ;;  %v1026_v58 = vsel %vm64_vm0, %v1022_v56, 0.0 }
 0x899   :  { %1027 = vadd.xlane.f32.xlu0 %v1026_v58 }
 0x925   :  { %v1031_v59 = vpop.xlane.xlu1 %1030 }
 0x926   :  { %v1033_v60 = vmul.f32 0.03125, %v1031_v59  ;;  %v1028_v61 = vpop.xlane.xlu0 %1027 }
 0x927   :  { %v1032_v62 = vmul.f32 0.03125, %v1028_v61 }
 0x928   :  { %v1035_v63 = vsub.f32 %v1023_v55, %v1033_v60 }
 0x929   :  { %v1034_v0 = vsub.f32 %v1022_v56, %v1032_v62 }
 0x92a   :  { %v1037_v1 = vmul.f32 %v1035_v63, %v1035_v63 }
 0x92b   :  { %v1036_v54 = vmul.f32 %v1034_v0, %v1034_v0 }
 0x92c   :  { %v1041_v2 = vsel %vm64_vm0, %v1037_v1, 0.0 }
 0x92d   :  { %1042 = vadd.xlane.f32.xlu1 %v1041_v2  ;;  %v1038_v3 = vsel %vm64_vm0, %v1036_v54, 0.0 }
 0x92e   :  { %1039 = vadd.xlane.f32.xlu0 %v1038_v3 }
 0x9ba   :  { %v1043_v4 = vpop.xlane.xlu1 %1042 }
 0x9bb   :  { %v1045_v12 = vmul.f32 0.03125, %v1043_v4  ;;  %v1040_v6 = vpop.xlane.xlu0 %1039 }
 0x9bc   :  { %v1044_v7 = vmul.f32 0.03125, %v1040_v6 }
 0x9bd   :  { %v1047_v5 = vadd.f32 1e-05, %v1045_v12 }
 0x9be   :  { %v1046_v8 = vadd.f32 1e-05, %v1044_v7 }
 0x9bf   :  { %1484 = vrsqrt.f32 %v1047_v5 }
 0x9c0   :  { %1486 = vrsqrt.f32 %v1046_v8 }
 0x9c9   :  { %v1485_v9 = vpop.eup %1484 }
 0x9ca   :  { %v1487_v11 = vpop.eup %1486  ;;  %v1051_v13 = vmul.f32 %v1485_v9, %v1035_v63 }
 0x9cb   :  { %v1050_v14 = vmul.f32 %v1487_v11, %v1034_v0 }
 0x9cc   :  { %v1057_v25 = vmul.f32 %v1120_v10, %v1051_v13 }
 0x9cd   :  { %v1056_v26 = vmul.f32 %v1120_v10, %v1050_v14 }
 0x9ce   :  { %v1063_v27 = vadd.f32 %v1121_v15, %v1057_v25 }
 0x9cf   :  { %v1062_v28 = vadd.f32 %v1121_v15, %v1056_v26 }
 0x9d0   :  { %1065 = vst.msk [vmem:[#allocation2 + $0x8] sm:$0xff] %vm64_vm0, %v1063_v27 }
 0x9d1   :  { %1064 = vst.msk [vmem:[#allocation2] sm:$0xff] %vm64_vm0, %v1062_v28 }
 0x9d2   :  { %1499 = shalt.err (!%p1496_p4)
}
 0x9d3   :  { %s1500_s17 = scalar_lea.hbm %s1934_s15, 256 }
 0x9d4   :  { %p1501_p5 = scmp.ne.s32.totalorder %s1934_s15, %s1500_s17  ;;  %p1504_p6 = scmp.lt.u32.totalorder %s1500_s17, %s1934_s15 }
 0x9d6   :  { %p1506_p7 = pnand %p1504_p6, %p1501_p5 }
 0x9d8   :  { %1509 = shalt.err (!%p1506_p7)
}
 0x9d9   :  { %s1518_s6 = smov 128   ;;  %s1519_s20 = smov 8  }
 0x9da   :  { %1077 = dma.vmem_to_hbm [thread:$0]  %s1072_s30, 256, %s1934_s15, [#allocation3], %s1518_s6, %s1518_s6, %s1519_s20  }
 0x9db   :  { %1510 = dma.done.wait [#allocation3], 256  }
 0x9dc   :  { %1511 = vsyncadd [#allocation3], 4294967040 }
 0x9dd   :  { %1081 = vsyncpa [#allocation3], 1 }

</bundles_post_ra>
